<compile_context>
chip_gen: v6e
topology: v6e:2x2x1
jax: 0.10.0
libtpu: 0.0.40
codegen_flags: <defaults>
</compile_context>

<pallas_src>
import functools

import jax
import jax.numpy as jnp
from jax.experimental import pallas as pl
from jax.experimental.pallas import tpu as pltpu

FPAD = 128   # padded feature width (lane axis); covers the max channel count (64)
TM = 256     # A_hat row-tile size (256x256 MXU on v6e/v7x; 2 passes/dim on v5e)


def fused_gcn_kernel(a_ref, x_ref, w_ref, b_ref, o_ref, h_ref, xw_ref,
                     *, n_pad, tm, num_layers):
    """Grid = (layer, row_tile); one invocation = one row tile of one layer.

    a_ref : (TM, n_pad)     bf16  A_hat rows of this tile (cols = source nodes)
    x_ref : (n_pad, FPAD)   bf16  initial node features (constant index -> fetched once)
    w_ref : (1, FPAD, FPAD) bf16  weight of the current layer
    b_ref : (1, 1, FPAD)    f32   bias of the current layer
    o_ref : (TM, FPAD)      f32   output rows (only the last layer's write survives)
    h_ref : (2*n_pad, FPAD) bf16  ping-pong activation buffer (persists across grid)
    xw_ref: (n_pad, FPAD)   bf16  X @ W for the current layer (computed at m == 0)
    """
    l = pl.program_id(0)
    m = pl.program_id(1)

    parity = l % 2                                    # which half of h_ref is this layer's input
    src_off = pl.multiple_of(parity * n_pad, 256)
    dst_off = pl.multiple_of((1 - parity) * n_pad, 256)

    # One-time copy of the input features into the first half of the ping-pong buffer.
    @pl.when(jnp.logical_and(l == 0, m == 0))
    def _():
        h_ref[pl.ds(0, n_pad), :] = x_ref[...]

    # Per-layer feature transform XW = H_l @ W_l, computed once per layer (at m == 0).
    @pl.when(m == 0)
    def _():
        h_in = h_ref[pl.ds(src_off, n_pad), :]
        xw = jnp.dot(h_in, w_ref[0], preferred_element_type=jnp.float32)
        xw_ref[...] = xw.astype(xw_ref.dtype)

    # Neighborhood aggregation for this row tile: Y = A_hat[tile] @ XW (f32 accumulate).
    y = jnp.dot(a_ref[...], xw_ref[...], preferred_element_type=jnp.float32)
    y = y + b_ref[0]                                  # (1, FPAD) broadcast, f32 epilogue
    is_last = l == num_layers - 1
    y = jnp.where(is_last, y, jnp.maximum(y, 0.0))    # ReLU on all but the last layer

    # Stash this layer's activation rows for the next layer (other half of h_ref).
    row = pl.multiple_of(dst_off + m * tm, tm)

    @pl.when(jnp.logical_not(is_last))
    def _():
        h_ref[pl.ds(row, tm), :] = y.astype(h_ref.dtype)

    o_ref[...] = y.astype(o_ref.dtype)


def normalized_adjacency(edge_index, num_nodes):
    """A_hat = D^{-1/2} (A + I) D^{-1/2}; rows = target nodes, cols = source nodes."""
    src = edge_index[0]
    dst = edge_index[1]
    a = jnp.zeros((num_nodes, num_nodes), jnp.float32)
    a = a.at[dst, src].add(1.0)
    a = a + jnp.eye(num_nodes, dtype=jnp.float32)     # add self-loops
    deg = a.sum(axis=1)
    d_inv_sqrt = jnp.where(deg > 0, 1.0 / jnp.sqrt(deg), 0.0)
    return d_inv_sqrt[:, None] * a * d_inv_sqrt[None, :]


def pad_to(arr, shape):
    pads = [(0, s - d) for d, s in zip(arr.shape, shape)]
    return jnp.pad(arr, pads)


def build_params(key):
    """Deterministic weights mimicking GCNConv init (glorot-ish W, zero bias)."""
    dims = [1, 64, 32, 16, 1]   # conv1..conv4 channel sizes
    params = []
    for i in range(4):
        key, k_w = jax.random.split(key)
        fin, fout = dims[i], dims[i + 1]
        w = jax.random.normal(k_w, (fin, fout), jnp.float32) / jnp.sqrt(
            jnp.float32(fin))
        b = jnp.zeros((fout,), jnp.float32)
        params.append((w, b))
    return params


def gcn_forward(x, edge_index, params):
    n = x.shape[0]
    num_layers = len(params)
    n_pad = ((n + TM - 1) // TM) * TM

    a_hat = normalized_adjacency(edge_index, n)
    a_pad = pad_to(a_hat, (n_pad, n_pad)).astype(jnp.bfloat16)
    x_pad = pad_to(x.astype(jnp.float32), (n_pad, FPAD)).astype(jnp.bfloat16)
    w_stack = jnp.stack(
        [pad_to(w, (FPAD, FPAD)) for w, _ in params]).astype(jnp.bfloat16)
    b_stack = jnp.stack(
        [pad_to(b, (FPAD,)).reshape(1, FPAD) for _, b in params])   # (L, 1, FPAD) f32

    kernel = functools.partial(
        fused_gcn_kernel, n_pad=n_pad, tm=TM, num_layers=num_layers)

    out = pl.pallas_call(
        kernel,
        out_shape=jax.ShapeDtypeStruct((n_pad, FPAD), jnp.float32),
        grid_spec=pltpu.PrefetchScalarGridSpec(
            num_scalar_prefetch=0,
            grid=(num_layers, n_pad // TM),
            in_specs=[
                pl.BlockSpec((TM, n_pad), lambda l, m: (m, 0)),          # A_hat row tile
                pl.BlockSpec((n_pad, FPAD), lambda l, m: (0, 0)),        # x (resident)
                pl.BlockSpec((1, FPAD, FPAD), lambda l, m: (l, 0, 0)),   # W_l
                pl.BlockSpec((1, 1, FPAD), lambda l, m: (l, 0, 0)),      # b_l
            ],
            out_specs=pl.BlockSpec((TM, FPAD), lambda l, m: (m, 0)),
            scratch_shapes=[
                pltpu.VMEM((2 * n_pad, FPAD), jnp.bfloat16),   # ping-pong activations
                pltpu.VMEM((n_pad, FPAD), jnp.bfloat16),       # XW of current layer
            ],
        ),
        compiler_params=pltpu.CompilerParams(
            # Row axis stays "arbitrary": layer l+1 reads ALL row tiles of layer l
            # through the shared VMEM scratch, so megacore sharding of the row
            # axis would break the cross-layer dependence.
            dimension_semantics=("arbitrary", "arbitrary"),
            vmem_limit_bytes=48 * 1024 * 1024,
        ),
    )(a_pad, x_pad, w_stack, b_stack)

    # Final layer has 1 output feature -> slice padding away.
    return out[:n, : params[-1][0].shape[1]]


def gcn_reference(x, edge_index, params):
    """Pure-JAX f32 reference of the same forward pass."""
    n = x.shape[0]
    a_hat = normalized_adjacency(edge_index, n)
    h = x.astype(jnp.float32)
    for i, (w, b) in enumerate(params):
        h = a_hat @ (h @ w) + b[None, :]
        if i < len(params) - 1:
            h = jnp.maximum(h, 0.0)
    return h


if __name__ == "__main__":
    key = jax.random.PRNGKey(0)
    k_x, k_params = jax.random.split(key)

    num_nodes = 64
    # node features: (N, 1), like data.x for GCNConv(1, 64)
    x = jax.random.normal(k_x, (num_nodes, 1), jnp.float32)

    # edge_index: (2, E) bidirectional ring graph (row 0 = source, row 1 = target)
    idx = jnp.arange(num_nodes, dtype=jnp.int32)
    nxt = (idx + 1) % num_nodes
    src = jnp.concatenate([idx, nxt])
    dst = jnp.concatenate([nxt, idx])
    edge_index = jnp.stack([src, dst], axis=0)

    params = build_params(k_params)

    out = gcn_forward(x, edge_index, params)
    out = jax.block_until_ready(out)
    assert out.shape == (num_nodes, 1)

    ref = gcn_reference(x, edge_index, params)
    assert jnp.allclose(out, ref, atol=5e-2, rtol=5e-2), float(
        jnp.max(jnp.abs(out - ref)))
    print("KERNEL_OK")
</pallas_src>

<mosaic_0001>
module attributes {stable_mosaic.version = 11 : i64} {
  func.func @fused_gcn_kernel(%arg0: i32, %arg1: i32, %arg2: memref<256x256xbf16, #tpu.memory_space<vmem>>, %arg3: memref<256x128xbf16, #tpu.memory_space<vmem>>, %arg4: memref<1x128x128xbf16, #tpu.memory_space<vmem>>, %arg5: memref<1x1x128xf32, #tpu.memory_space<vmem>>, %arg6: memref<256x128xf32, #tpu.memory_space<vmem>>, %arg7: memref<512x128xbf16, #tpu.memory_space<vmem>>, %arg8: memref<256x128xbf16, #tpu.memory_space<vmem>>) attributes {dimension_semantics = [#tpu.dimension_semantics<arbitrary>, #tpu.dimension_semantics<arbitrary>], iteration_bounds = array<i64: 4, 1>, scalar_prefetch = 0 : i64, scratch_operands = 2 : i64, tpu.core_type = #tpu.core_type<tc>, window_params = [{transform_indices = @transform_0, window_bounds = array<i64: 256, 256>}, {pipeline_mode = #tpu.pipeline_mode<synchronous>, transform_indices = @transform_1, window_bounds = array<i64: 256, 128>}, {transform_indices = @transform_2, window_bounds = array<i64: 1, 128, 128>}, {transform_indices = @transform_3, window_bounds = array<i64: 1, 1, 128>}, {transform_indices = @transform_4, window_bounds = array<i64: 256, 128>}]} {
    %c2_i32 = arith.constant 2 : i32
    %c0_i32 = arith.constant 0 : i32
    %0 = arith.cmpi eq, %c2_i32, %c0_i32 : i32
    %c1_i32 = arith.constant 1 : i32
    %1 = arith.select %0, %c1_i32, %c2_i32 : i32
    %2 = arith.remsi %arg0, %1 : i32
    %c0_i32_0 = arith.constant 0 : i32
    %3 = arith.cmpi ne, %2, %c0_i32_0 : i32
    %c0_i32_1 = arith.constant 0 : i32
    %4 = arith.cmpi slt, %2, %c0_i32_1 : i32
    %c0_i32_2 = arith.constant 0 : i32
    %5 = arith.cmpi slt, %1, %c0_i32_2 : i32
    %6 = arith.xori %4, %5 : i1
    %7 = arith.andi %6, %3 : i1
    %8 = arith.addi %2, %1 : i32
    %9 = arith.select %7, %8, %2 : i32
    %c256_i32 = arith.constant 256 : i32
    %10 = arith.muli %9, %c256_i32 : i32
    %11 = tpu.assume_multiple %10, 256 : i32
    %c1_i32_3 = arith.constant 1 : i32
    %12 = arith.subi %c1_i32_3, %9 : i32
    %c256_i32_4 = arith.constant 256 : i32
    %13 = arith.muli %12, %c256_i32_4 : i32
    %14 = tpu.assume_multiple %13, 256 : i32
    %c0_i32_5 = arith.constant 0 : i32
    %15 = arith.cmpi eq, %arg0, %c0_i32_5 : i32
    %c0_i32_6 = arith.constant 0 : i32
    %16 = arith.cmpi eq, %arg1, %c0_i32_6 : i32
    %17 = arith.andi %15, %16 : i1
    %18 = arith.extui %17 : i1 to i32
    %c0_i32_7 = arith.constant 0 : i32
    %19 = arith.cmpi ne, %18, %c0_i32_7 : i32
    scf.if %19 {
      %c0_21 = arith.constant 0 : index
      %c0_22 = arith.constant 0 : index
      %41 = vector.load %arg3[%c0_21, %c0_22] : memref<256x128xbf16, #tpu.memory_space<vmem>>, vector<256x128xbf16>
      %c0_23 = arith.constant 0 : index
      %c0_24 = arith.constant 0 : index
      %42 = vector.load %arg7[%c0_23, %c0_24] : memref<512x128xbf16, #tpu.memory_space<vmem>>, vector<256x128xbf16>
      tpu.vector_store %arg7[%c0_23, %c0_24], %41 {strides = array<i32>} : memref<512x128xbf16, #tpu.memory_space<vmem>>, vector<256x128xbf16>,
    } else {
    }
    %c0_i32_8 = arith.constant 0 : i32
    %20 = arith.cmpi eq, %arg1, %c0_i32_8 : i32
    %21 = arith.extui %20 : i1 to i32
    %c0_i32_9 = arith.constant 0 : i32
    %22 = arith.cmpi ne, %21, %c0_i32_9 : i32
    scf.if %22 {
      %41 = arith.index_cast %11 : i32 to index
      %c0_21 = arith.constant 0 : index
      %42 = vector.load %arg7[%41, %c0_21] : memref<512x128xbf16, #tpu.memory_space<vmem>>, vector<256x128xbf16>
      %c0_22 = arith.constant 0 : index
      %c0_23 = arith.constant 0 : index
      %c0_24 = arith.constant 0 : index
      %43 = vector.load %arg4[%c0_22, %c0_23, %c0_24] : memref<1x128x128xbf16, #tpu.memory_space<vmem>>, vector<1x128x128xbf16>
      %44 = vector.shape_cast %43 : vector<1x128x128xbf16> to vector<128x128xbf16>
      %cst_25 = arith.constant dense<0.000000e+00> : vector<256x128xf32>
      %45 = tpu.matmul %42, %44, %cst_25 {dimension_numbers = #tpu.dot_dimension_numbers<[1], [0], [0], [1], [0, 0, 1, 1], [], []>} : vector<256x128xbf16>, vector<128x128xbf16>, vector<256x128xf32> -> vector<256x128xf32>
      %46 = arith.truncf %45 : vector<256x128xf32> to vector<256x128xbf16>
      %c0_26 = arith.constant 0 : index
      %c0_27 = arith.constant 0 : index
      %47 = vector.load %arg8[%c0_26, %c0_27] : memref<256x128xbf16, #tpu.memory_space<vmem>>, vector<256x128xbf16>
      tpu.vector_store %arg8[%c0_26, %c0_27], %46 {strides = array<i32>} : memref<256x128xbf16, #tpu.memory_space<vmem>>, vector<256x128xbf16>,
    } else {
    }
    %c0 = arith.constant 0 : index
    %c0_10 = arith.constant 0 : index
    %23 = vector.load %arg2[%c0, %c0_10] : memref<256x256xbf16, #tpu.memory_space<vmem>>, vector<256x256xbf16>
    %c0_11 = arith.constant 0 : index
    %c0_12 = arith.constant 0 : index
    %24 = vector.load %arg8[%c0_11, %c0_12] : memref<256x128xbf16, #tpu.memory_space<vmem>>, vector<256x128xbf16>
    %cst = arith.constant dense<0.000000e+00> : vector<256x128xf32>
    %25 = tpu.matmul %23, %24, %cst {dimension_numbers = #tpu.dot_dimension_numbers<[1], [0], [0], [1], [0, 0, 1, 1], [], []>} : vector<256x256xbf16>, vector<256x128xbf16>, vector<256x128xf32> -> vector<256x128xf32>
    %c0_13 = arith.constant 0 : index
    %c0_14 = arith.constant 0 : index
    %c0_15 = arith.constant 0 : index
    %26 = vector.load %arg5[%c0_13, %c0_14, %c0_15] : memref<1x1x128xf32, #tpu.memory_space<vmem>>, vector<1x1x128xf32>
    %27 = vector.shape_cast %26 : vector<1x1x128xf32> to vector<1x128xf32>
    %28 = vector.broadcast %27 : vector<1x128xf32> to vector<256x128xf32>
    %29 = arith.addf %25, %28 : vector<256x128xf32>
    %c3_i32 = arith.constant 3 : i32
    %30 = arith.cmpi eq, %arg0, %c3_i32 : i32
    %cst_16 = arith.constant 0.000000e+00 : f32
    %31 = vector.broadcast %cst_16 : f32 to vector<256x128xf32>
    %32 = arith.maximumf %29, %31 : vector<256x128xf32>
    %33 = arith.select %30, %29, %32 : vector<256x128xf32>
    %c256_i32_17 = arith.constant 256 : i32
    %34 = arith.muli %arg1, %c256_i32_17 : i32
    %35 = arith.addi %14, %34 : i32
    %36 = tpu.assume_multiple %35, 256 : i32
    %true = arith.constant true
    %37 = arith.xori %30, %true : i1
    %38 = arith.extui %37 : i1 to i32
    %c0_i32_18 = arith.constant 0 : i32
    %39 = arith.cmpi ne, %38, %c0_i32_18 : i32
    scf.if %39 {
      %41 = arith.truncf %33 : vector<256x128xf32> to vector<256x128xbf16>
      %42 = arith.index_cast %36 : i32 to index
      %c0_21 = arith.constant 0 : index
      %43 = vector.load %arg7[%42, %c0_21] : memref<512x128xbf16, #tpu.memory_space<vmem>>, vector<256x128xbf16>
      tpu.vector_store %arg7[%42, %c0_21], %41 {strides = array<i32>} : memref<512x128xbf16, #tpu.memory_space<vmem>>, vector<256x128xbf16>,
    } else {
    }
    %c0_19 = arith.constant 0 : index
    %c0_20 = arith.constant 0 : index
    %40 = vector.load %arg6[%c0_19, %c0_20] : memref<256x128xf32, #tpu.memory_space<vmem>>, vector<256x128xf32>
    tpu.vector_store %arg6[%c0_19, %c0_20], %33 {strides = array<i32>} : memref<256x128xf32, #tpu.memory_space<vmem>>, vector<256x128xf32>,
    return
  }
  func.func @transform_0(%arg0: i32, %arg1: i32) -> (i32, i32) {
    %c0_i32 = arith.constant 0 : i32
    %c0_i32_0 = arith.constant 0 : i32
    return %arg1, %c0_i32 : i32, i32
  }
  func.func @transform_1(%arg0: i32, %arg1: i32) -> (i32, i32) {
    %c0_i32 = arith.constant 0 : i32
    %c0_i32_0 = arith.constant 0 : i32
    %c0_i32_1 = arith.constant 0 : i32
    return %c0_i32, %c0_i32_0 : i32, i32
  }
  func.func @transform_2(%arg0: i32, %arg1: i32) -> (i32, i32, i32) {
    %c0_i32 = arith.constant 0 : i32
    %c0_i32_0 = arith.constant 0 : i32
    %c0_i32_1 = arith.constant 0 : i32
    return %arg0, %c0_i32, %c0_i32_0 : i32, i32, i32
  }
  func.func @transform_3(%arg0: i32, %arg1: i32) -> (i32, i32, i32) {
    %c0_i32 = arith.constant 0 : i32
    %c0_i32_0 = arith.constant 0 : i32
    %c0_i32_1 = arith.constant 0 : i32
    return %arg0, %c0_i32, %c0_i32_0 : i32, i32, i32
  }
  func.func @transform_4(%arg0: i32, %arg1: i32) -> (i32, i32) {
    %c0_i32 = arith.constant 0 : i32
    %c0_i32_0 = arith.constant 0 : i32
    return %arg1, %c0_i32 : i32, i32
  }
}

</mosaic_0001>

<bundles_post_ra>
// kernel: tpu_custom_call.1
= control target key start
LH: loop header
LB: loop body
LE: loop exit
PB: predicated region body
PF: predicated region fallthrough
CT: control target
= control target key end

     0   :  { %9 = vsyncpa [#allocation5], 0  ;;  %s3189_s0 = inlined_call_operand.hbm [shape: bf16[256,256], index: 0, kind: input, shape index: {}]   ;;  %s3190_s1 = inlined_call_operand.hbm [shape: bf16[256,128], index: 1, kind: input, shape index: {}]   ;;  %s3191_s2 = inlined_call_operand.hbm [shape: bf16[4,128,128], index: 2, kind: input, shape index: {}]   ;;  %s3192_s3 = inlined_call_operand.vmem [shape: f32[4,1,128], index: 3, kind: input, shape index: {}]   ;;  %s3193_s4 = inlined_call_operand.hbm [shape: f32[256,128], index: 4, kind: output, shape index: {}]  }
   0x1   :  { %10 = vsyncpa [#allocation8], 0 }
   0x2   :  { %11 = vsyncpa [#allocation6], 0  ;;  %s2742_s15 = smov 0   ;;  %s2744_s16 = smov 0  }
   0x3   :  { %s2746_s17 = smov 0   ;;  %s2748_s18 = smov 0  }
   0x4   :  { %s2750_s19 = smov 0   ;;  %s2752_s20 = smov 0  }
   0x5 LB: > { %s2771_s21 = sadd.s32 4294967295, %s2705_s20   ;;  %p90_p0 = scmp.ne.s32.totalorder %s2693_s17, %s2689_s16  ;;  %s2705_s20 = sphi %s2752_s20, %s17_s20   ;;  %s2701_s19 = sphi %s2750_s19, %s3211_s19   ;;  %s2697_s18 = sphi %s2748_s18, %s3210_s18   ;;  %s2693_s17 = sphi %s2746_s17, %s3209_s17   ;;  %s2689_s16 = sphi %s2744_s16, %s3208_s16   ;;  %s2685_s15 = sphi %s2742_s15, %s3207_s15  }
   0x6   : > { %p91_p1 = scmp.eq.s32.totalorder %s2705_s20, 0  ;;  %p96_p2 = scmp.ne.s32.totalorder %s2689_s16, %s2685_s15 }
   0x7   : > { %p3194_p3 = scmp.eq.s32.totalorder %s2771_s21, 0  ;;  %p1745_p4 = scmp.ge.s32.totalorder %s2705_s20, 1 }
   0x8   : > { %p92_p5 = por %p91_p1, %p90_p0  ;;  %p159_p6 = scmp.lt.s32.totalorder %s2705_s20, 5 }
   0x9   : > { %p2782_p7 = por %p3194_p3, %p96_p2  ;;  %s2707_s24 = smov [#allocation4]  }
   0xa   : > { %p2786_p8 = pnand %p1745_p4, %p159_p6  ;;  %s175_s25 = sshll.u32 %s2707_s24, 4  ;;  %s176_s25 = int_to_ptr.vmem [resolvable:$true] %s175_s25 }
   0xb   : > { %p2389_p11 = scmp.lt.s32.totalorder %s2705_s20, 4  ;;  %s2550_s28 = scalar_lea.vmem %s176_s25, 4096 }
   0xc   : > { %p2376_p9 = pneg %p2786_p8  ;;  %p2551_p0 = scmp.ne.s32.totalorder %s176_s25, %s2550_s28 }
   0xd   : > { %p2799_p12 = pnand %p2389_p11, %p92_p5  ;;  %p2558_p4 = scmp.lt.s32.totalorder %s176_s25, %s176_s25 }
   0xe   : > { %p2794_p10 = pnand %p2376_p9, %p3194_p3  ;;  %p2559_p6 = scmp.lt.s32.totalorder %s2550_s28, %s2550_s28 }
  0x10   : > { %p2541_p13 = pneg %p2794_p10  ;;  %p2560_p9 = por %p2559_p6, %p2558_p4 }
  0x12   : > { %p2553_p1 = pnand %p2551_p0, %p2541_p13 }
  0x14   : > { %p2554_p2 = pneg %p2553_p1 }
  0x16   : > { %p2561_p3 = pnand %p2560_p9, %p2554_p2 }
  0x18   : > { %2564 = shalt.err (!%p2561_p3)
}
  0x19   : > { %s2708_s29 = smov 128   ;;  %s2709_s30 = smov 8  }
  0x1a   : > { %2379 = dma.hbm_to_vmem [thread:$0]  (!%p2794_p10), %s3189_s0, 4096, %s176_s25, [#allocation5], %s2708_s29, %s2708_s29, %s2709_s30  }
  0x1b   : > { %s2710_s7 = smov [#allocation7]  }
  0x1c   : > { %s188_s8 = sshll.u32 %s2710_s7, 4  ;;  %s189_s8 = int_to_ptr.vmem [resolvable:$true] %s188_s8 }
  0x1d   : > { %s2576_s9 = scalar_lea.vmem %s189_s8, 2048  ;;  %p2584_p1 = scmp.lt.s32.totalorder %s189_s8, %s189_s8 }
  0x1e   : > { %p2577_p5 = scmp.ne.s32.totalorder %s189_s8, %s2576_s9  ;;  %p2585_p3 = scmp.lt.s32.totalorder %s2576_s9, %s2576_s9 }
  0x20   : > { %p2579_p11 = pnand %p2577_p5, %p2541_p13  ;;  %p2586_p2 = por %p2585_p3, %p2584_p1 }
  0x22   : > { %p2580_p0 = pneg %p2579_p11 }
  0x24   : > { %p2587_p4 = pnand %p2586_p2, %p2580_p0 }
  0x26   : > { %2590 = shalt.err (!%p2587_p4)
}
  0x27   : > { %s2711_s10 = smov 64   ;;  %s2712_s11 = smov 4  }
  0x28   : > { %2382 = dma.hbm_to_vmem [thread:$0]  (!%p2794_p10), %s3190_s1, 2048, %s189_s8, [#allocation8], %s2711_s10, %s2711_s10, %s2712_s11  }
  0x29   : > { %s202_s15 = sand.u32 1, %s2705_s20   ;;  %s29_s24 = sadd.s32 1, %s2701_s19 }
  0x2a   : > { %p31_p13 = scmp.ge.s32.totalorder %s29_s24, 4  ;;  %s204_s25 = sand.u32 1, %s2693_s17  }
  0x2b   : > { %s1749_s28 = sshll.u32 %s204_s25, 6  ;;  %s1906_s29 = sshll.u32 %s2701_s19, 10 }
  0x2c   : > { %s3213_s24 = smov (%p31_p13, %s29_s24), 0  ;;  %s212_s26 = scalar_lea.hbm %s3191_s2, %s1906_s29 }
  0x2d   : > { %s80_s6 = ssub.s32 %s2701_s19, %s3213_s24  ;;  %s206_s7 = scalar_lea.vmem [#allocation9], %s1749_s28 }
  0x2e   : > { %s213_s9 = sshll.u32 %s206_s7, 4  ;;  %p2836_p6 = scmp.eq.s32.totalorder %s80_s6, 0  ;;  %s214_s9 = int_to_ptr.vmem [resolvable:$true] %s213_s9 }
  0x2f   : > { %s203_s12 = scalar_lea.sflag [#allocation5], %s202_s15  ;;  %p2593_p10 = pneg %p2799_p12 }
  0x30   : > { %s2604_s13 = scalar_lea.vmem %s214_s9, 1024  ;;  %s2713_s25 = smov [#allocation9]  }
  0x31   : > { %p2605_p9 = scmp.ne.s32.totalorder %s214_s9, %s2604_s13  ;;  %s2609_s14 = sshll.u32 %s2713_s25, 4  ;;  %s2610_s14 = int_to_ptr.vmem [resolvable:$false] %s2609_s14 }
  0x32   : > { %s2611_s30 = scalar_lea.vmem %s2610_s14, 2048  ;;  %p2612_p0 = scmp.lt.s32.totalorder %s214_s9, %s2610_s14 }
  0x33   : > { %p2607_p5 = pnand %p2605_p9, %p2593_p10  ;;  %p2613_p1 = scmp.lt.s32.totalorder %s2611_s30, %s2604_s13 }
  0x35   : > { %p2608_p11 = pneg %p2607_p5  ;;  %p2614_p3 = por %p2613_p1, %p2612_p0 }
  0x37   : > { %p2615_p2 = pnand %p2614_p3, %p2608_p11 }
  0x39   : > { %2618 = shalt.err (!%p2615_p2)
}
  0x3a   : > { %2386 = dma.hbm_to_vmem [thread:$0]  (!%p2799_p12), %s212_s26, 1024, %s214_s9, %s203_s12, %s2711_s10, %s2711_s10, %s2712_s11  }
  0x3b   : > { %s3200_s15 = sadd.s32 1, %s2693_s17  ;;  %231 = sbr.rel (%p2786_p8) target bundleno = 739 (0x2e3), region = 36 }
  0x3c   : > { %s2852_s28 = scalar_select %p2836_p6, %s2693_s17, %s3200_s15  }
  0x3d   : > { %p3201_p4 = scmp.eq.s32.totalorder (!%p2786_p8), %s2771_s21, 0 }
  0x40   : > { %2668 = dma.done.wait (%p3201_p4), [#allocation5], 4096   ;;  %p3202_p13 = pmov %p3201_p4 }
  0x41   : > { %p3203_p10 = pmov %p3201_p4 }
  0x42   : > { %2670 = vsyncadd (%p3202_p13), [#allocation5], 4294963200 }
  0x43   : > { %2672 = dma.done.wait (%p3203_p10), [#allocation8], 2048   ;;  %p3204_p9 = pmov %p3201_p4 }
  0x44   : > { %s241_s27 = sand.u32 1, %s2771_s21   ;;  %s243_s10 = sand.u32 1, %s2689_s16  }
  0x45   : > { %2674 = vsyncadd (%p3204_p9), [#allocation8], 4294965248  ;;  %s1755_s11 = sshll.u32 %s243_s10, 6  ;;  %s242_s23 = scalar_lea.sflag [#allocation5], %s241_s27 }
  0x46   : > { %s2866_s14 = scalar_lea.vmem [#allocation9], %s1755_s11 }
  0x47   : > { %2676 = dma.done.wait (%p2782_p7), %s242_s23, 1024  }
  0x48   : > { %2678 = vsyncadd (%p2782_p7), %s242_s23, 4294966272  ;;  %p269_p8 = scmp.lt.s32.totalorder %s2697_s18, 3  ;;  %p274_p12 = scmp.lt.s32.totalorder %s2697_s18, 0 }
  0x49   : > { %s275_s29 = ssub.s32 0, %s2697_s18  ;;  %p289_p6 = scmp.eq.s32.totalorder %s2697_s18, 0 }
  0x4a   : > { %s2877_s5 = scalar_select %p269_p8, %s2697_s18, 3  ;;  %v295_v0 = vld [vmem:[#allocation7] sm:$0xff] (%p289_p6)   ;;  %v297_v1 = vld [vmem:[#allocation7 + $0x8] sm:$0xff] (%p289_p6)   ;;  %v299_v2 = vld [vmem:[#allocation7 + $0x10] sm:$0xff] (%p289_p6)  }
  0x4b   : > { %s1756_s26 = smin.u32 %s2697_s18, %s275_s29  ;;  %327 = vst [vmem:[#allocation2] sm:$0xff] (%p289_p6), %v295_v0   ;;  %329 = vst [vmem:[#allocation2 + $0x8] sm:$0xff] (%p289_p6), %v297_v1   ;;  %v301_v3 = vld [vmem:[#allocation7 + $0x18] sm:$0xff] (%p289_p6)   ;;  %v303_v4 = vld [vmem:[#allocation7 + $0x20] sm:$0xff] (%p289_p6)  }
  0x4c   : > { %s271_s9 = scalar_lea.vmem %s3192_s3, %s2877_s5  ;;  %s277_s22 = sand.u32 1, %s1756_s26   ;;  %331 = vst [vmem:[#allocation2 + $0x10] sm:$0xff] (%p289_p6), %v299_v2   ;;  %v305_v5 = vld [vmem:[#allocation7 + $0x28] sm:$0xff] (%p289_p6)   ;;  %333 = vst [vmem:[#allocation2 + $0x18] sm:$0xff] (%p289_p6), %v301_v3   ;;  %v307_v6 = vld [vmem:[#allocation7 + $0x30] sm:$0xff] (%p289_p6)  }
  0x4d   : > { %s278_s8 = ssub.s32 0, %s277_s22  ;;  %335 = vst [vmem:[#allocation2 + $0x20] sm:$0xff] (%p289_p6), %v303_v4   ;;  %337 = vst [vmem:[#allocation2 + $0x28] sm:$0xff] (%p289_p6), %v305_v5   ;;  %v309_v7 = vld [vmem:[#allocation7 + $0x38] sm:$0xff] (%p289_p6)   ;;  %v311_v8 = vld [vmem:[#allocation7 + $0x40] sm:$0xff] (%p289_p6)  }
  0x4e   : > { %s3215_s8 = smov (!%p274_p12, %s278_s8), %s277_s22  ;;  %339 = vst [vmem:[#allocation2 + $0x30] sm:$0xff] (%p289_p6), %v307_v6   ;;  %341 = vst [vmem:[#allocation2 + $0x38] sm:$0xff] (%p289_p6), %v309_v7   ;;  %v313_v9 = vld [vmem:[#allocation7 + $0x48] sm:$0xff] (%p289_p6)   ;;  %v315_v10 = vld [vmem:[#allocation7 + $0x50] sm:$0xff] (%p289_p6)  }
  0x4f   : > { %p1758_p7 = scmp.lt.s32.totalorder %s3215_s8, 0  ;;  %s284_s12 = sadd.s32 2, %s3215_s8  ;;  %343 = vst [vmem:[#allocation2 + $0x40] sm:$0xff] (%p289_p6), %v311_v8   ;;  %v317_v11 = vld [vmem:[#allocation7 + $0x58] sm:$0xff] (%p289_p6)   ;;  %345 = vst [vmem:[#allocation2 + $0x48] sm:$0xff] (%p289_p6), %v313_v9   ;;  %v319_v12 = vld [vmem:[#allocation7 + $0x60] sm:$0xff] (%p289_p6)  }
  0x50   : > { %294 = sbr.rel (!%p289_p6) target bundleno = 85 (0x55), region = 52  ;;  %347 = vst [vmem:[#allocation2 + $0x50] sm:$0xff] (%p289_p6), %v315_v10   ;;  %349 = vst [vmem:[#allocation2 + $0x58] sm:$0xff] (%p289_p6), %v317_v11   ;;  %v321_v13 = vld [vmem:[#allocation7 + $0x68] sm:$0xff] (%p289_p6)   ;;  %v323_v14 = vld [vmem:[#allocation7 + $0x70] sm:$0xff] (%p289_p6)  }
  0x51   : > { %s3217_s12 = smov (!%p1758_p7, %s284_s12), %s3215_s8  ;;  %351 = vst [vmem:[#allocation2 + $0x60] sm:$0xff] (%p289_p6), %v319_v12   ;;  %353 = vst [vmem:[#allocation2 + $0x68] sm:$0xff] (%p289_p6), %v321_v13   ;;  %v325_v15 = vld [vmem:[#allocation7 + $0x78] sm:$0xff] (%p289_p6)  }
  0x52   : > { %s1759_s13 = sshll.u32 %s3217_s12, 8  ;;  %s287_s25 = ssub.s32 1, %s3217_s12  ;;  %355 = vst [vmem:[#allocation2 + $0x70] sm:$0xff] (%p289_p6), %v323_v14   ;;  %357 = vst [vmem:[#allocation2 + $0x78] sm:$0xff] (%p289_p6), %v325_v15  }
  0x53   : > { %s2888_s30 = sshll.u32 %s287_s25, 8 }
  0x55 PF: > { %v2451_v16 = vld [vmem:[%s2866_s14 + $0x38] sm:$0xff]   ;;  %s362_s15 = sshra.s32 %s1759_s13, 3  ;;  %v2452_v17 = vld [vmem:[%s2866_s14 + $0x30] sm:$0xff]   ;;  %v2453_v18 = vld [vmem:[%s2866_s14 + $0x28] sm:$0xff]   ;;  %p1367_p5 = scmp.eq.s32.totalorder %s2697_s18, 3 }
  0x56   : > { %2298 = vmatprep.subr.bf16.mxu0 %v2451_v16  ;;  %s1762_s27 = sshll.u32 %s362_s15, 2  ;;  %v2454_v19 = vld [vmem:[%s2866_s14 + $0x20] sm:$0xff]   ;;  %v2455_v21 = vld [vmem:[%s2866_s14 + $0x18] sm:$0xff]   ;;  %v2456_v22 = vld [vmem:[%s2866_s14 + $0x10] sm:$0xff]   ;;  %s1569_s29 = sshra.s32 (!%p1367_p5), %s2888_s30, 3 }
  0x57   : > { %2299 = vmatpush3.bf16.msra.mxu0 %v2451_v16  ;;  %s2896_s10 = scalar_lea.vmem [#allocation2], %s1762_s27  ;;  %v2457_v23 = vld [vmem:[%s2866_s14 + $0x8] sm:$0xff]   ;;  %v2458_v24 = vld [vmem:[%s2866_s14] sm:$0xff]   ;;  %s1901_s5 = sshll.u32 (!%p1367_p5), %s1569_s29, 2 }
  0x58   : > { %2300 = vmatprep.subr.bf16.mxu0 %v2452_v17  ;;  %v2493_v40 = vld [vmem:[#allocation4 + $0x44] ss:$8 sps:$4 sm:$0xff]   ;;  %s1400_s11 = scalar_select %p1367_p5, 1, 0 }
  0x59   : > { %v2459_v20 = vld [vmem:[%s2896_s10] sm:$0xff]   ;;  %v2460_v25 = vld [vmem:[%s2896_s10 + $0x8] sm:$0xff]   ;;  %v2461_v26 = vld [vmem:[%s2896_s10 + $0x10] sm:$0xff]   ;;  %1270 = vmatprep.mubr.bf16.mxu1 %v2493_v40  ;;  %s1572_s18 = scalar_lea.vmem (!%p1367_p5), [#allocation2], %s1901_s5 }
  0x5a   : > { %2314 = vmatprep.mubr.bf16.mxu0 %v2459_v20  ;;  %v2462_v27 = vld [vmem:[%s2896_s10 + $0x18] sm:$0xff]   ;;  %v2463_v28 = vld [vmem:[%s2896_s10 + $0x20] sm:$0xff]   ;;  %v2464_v29 = vld [vmem:[%s2896_s10 + $0x28] sm:$0xff]  }
  0x5b   : > { %2301 = vmatpush3.bf16.msra.mxu0 %v2452_v17  ;;  %v2465_v30 = vld [vmem:[%s2896_s10 + $0x30] sm:$0xff]   ;;  %v2466_v31 = vld [vmem:[%s2896_s10 + $0x38] sm:$0xff]   ;;  %v2467_v32 = vld [vmem:[%s2896_s10 + $0x40] sm:$0xff]  }
  0x5c   : > { %2302 = vmatprep.subr.bf16.mxu0 %v2453_v18  ;;  %v2468_v33 = vld [vmem:[%s2896_s10 + $0x48] sm:$0xff]   ;;  %v2469_v34 = vld [vmem:[%s2896_s10 + $0x50] sm:$0xff]   ;;  %v2470_v35 = vld [vmem:[%s2896_s10 + $0x58] sm:$0xff]  }
  0x5d   : > { %v2471_v36 = vld [vmem:[%s2896_s10 + $0x60] sm:$0xff]   ;;  %v2472_v37 = vld [vmem:[%s2896_s10 + $0x68] sm:$0xff]   ;;  %v2473_v38 = vld [vmem:[%s2896_s10 + $0x70] sm:$0xff]  }
  0x5e   : > { %v2474_v39 = vld [vmem:[%s2896_s10 + $0x78] sm:$0xff]   ;;  %v2514_v60 = vld [vmem:[#allocation4 + $0x4] ss:$8 sps:$4 sm:$0xff]  }
  0x5f   : > { %2303 = vmatpush3.bf16.msra.mxu0 %v2453_v18 }
  0x60   : > { %2304 = vmatprep.subr.bf16.mxu0 %v2454_v19 }
  0x63   : > { %2305 = vmatpush3.bf16.msra.mxu0 %v2454_v19 }
  0x64   : > { %2306 = vmatprep.subr.bf16.mxu0 %v2455_v21 }
  0x67   : > { %2307 = vmatpush3.bf16.msra.mxu0 %v2455_v21 }
  0x68   : > { %2308 = vmatprep.subr.bf16.mxu0 %v2456_v22 }
  0x6b   : > { %2309 = vmatpush3.bf16.msra.mxu0 %v2456_v22 }
  0x6c   : > { %2310 = vmatprep.subr.bf16.mxu0 %v2457_v23 }
  0x6f   : > { %2311 = vmatpush3.bf16.msra.mxu0 %v2457_v23 }
  0x70   : > { %2312 = vmatprep.subr.bf16.mxu0 %v2458_v24 }
  0x73   : > { %2313 = vmatpush3.bf16.msra.mxu0 %v2458_v24 }
  0x76   : > { %2315 = vmatmul.mubr.bf16.vlgmr.msra.gmra.mxu0 %v2460_v25 }
  0x77   : > { %2318 = vmatprep.mubr.bf16.mxu0 %v2461_v26 }
  0x7e   : > { %2319 = vmatmul.mubr.bf16.gmra.mxu0 %v2462_v27 }
  0x7f   : > { %2322 = vmatprep.mubr.bf16.mxu0 %v2463_v28 }
  0x86   : > { %2323 = vmatmul.mubr.bf16.gmra.mxu0 %v2464_v29 }
  0x87   : > { %2326 = vmatprep.mubr.bf16.mxu0 %v2465_v30 }
  0x8e   : > { %2327 = vmatmul.mubr.bf16.gmra.mxu0 %v2466_v31 }
  0x8f   : > { %2330 = vmatprep.mubr.bf16.mxu0 %v2467_v32 }
  0x96   : > { %2331 = vmatmul.mubr.bf16.gmra.mxu0 %v2468_v33 }
  0x97   : > { %2334 = vmatprep.mubr.bf16.mxu0 %v2469_v34 }
  0x9e   : > { %2335 = vmatmul.mubr.bf16.gmra.mxu0 %v2470_v35 }
  0x9f   : > { %2338 = vmatprep.mubr.bf16.mxu0 %v2471_v36 }
  0xa6   : > { %2339 = vmatmul.mubr.bf16.gmra.mxu0 %v2472_v37 }
  0xa7   : > { %2342 = vmatprep.mubr.bf16.mxu0 %v2473_v38 }
  0xae   : > { %2343 = vmatmul.mubr.bf16.gmra.mxu0 %v2474_v39 }
  0xaf   : > { %1238 = vmatprep.mubr.bf16.mxu0 %v2514_v60  ;;  %v2509_v60 = vld [vmem:[#allocation4 + $0xa4] ss:$8 sps:$4 sm:$0xff]  }
 0x136   : > { %v2316_v41 = vpop.f32.mrf.mxu0 }
 0x138   : > { %v592_v42 = vpop.f32.mrf.mxu0 }
 0x13a   : > { %v2317_v43 = vpop.f32.mrf.mxu0 }
 0x13b   : > { %v1980_v44 = vpack.c.bf16 %v2317_v43, %v2316_v41  ;;  %v2512_v43 = vld [vmem:[#allocation4] ss:$8 sps:$4 sm:$0xff]  }
 0x13c   : > { %v595_v45 = vpop.f32.mrf.mxu0 }
 0x13d   : > { %2132 = vst [vmem:[#allocation3 + $0x8] sm:$0xff] %v1980_v44   ;;  %v1975_v46 = vpack.c.bf16 %v595_v45, %v592_v42  ;;  %v2491_v42 = vld [vmem:[#allocation4 + $0x40] ss:$8 sps:$4 sm:$0xff]   ;;  %v2494_v44 = vld [vmem:[#allocation4 + $0x54] ss:$8 sps:$4 sm:$0xff]  }
 0x13e   : > { %v2320_v47 = vpop.f32.mrf.mxu0  ;;  %v2518_v45 = vld [vmem:[#allocation4 + $0x14] ss:$8 sps:$4 sm:$0xff]  }
 0x13f   : > { %1976 = vst [vmem:[#allocation3] sm:$0xff] %v1975_v46   ;;  %v2496_v46 = vld [vmem:[#allocation4 + $0x50] ss:$8 sps:$4 sm:$0xff]  }
 0x140   : > { %v608_v48 = vpop.f32.mrf.mxu0 }
 0x142   : > { %v2321_v49 = vpop.f32.mrf.mxu0 }
 0x143   : > { %v1990_v50 = vpack.c.bf16 %v2321_v49, %v2320_v47  ;;  %v2522_v47 = vld [vmem:[#allocation4 + $0x10] ss:$8 sps:$4 sm:$0xff]   ;;  %v2524_v49 = vld [vmem:[#allocation4 + $0x24] ss:$8 sps:$4 sm:$0xff]  }
 0x144   : > { %v611_v51 = vpop.f32.mrf.mxu0  ;;  %v2488_v39 = vld [vmem:[#allocation3 + $0x8] sm:$0xff]  }
 0x145   : > { %2134 = vst [vmem:[#allocation3 + $0x18] sm:$0xff] %v1990_v50   ;;  %v1985_v52 = vpack.c.bf16 %v611_v51, %v608_v48  ;;  %v2497_v48 = vld [vmem:[#allocation4 + $0x64] ss:$8 sps:$4 sm:$0xff]   ;;  %v2499_v50 = vld [vmem:[#allocation4 + $0x60] ss:$8 sps:$4 sm:$0xff]  }
 0x146   : > { %v2324_v53 = vpop.f32.mrf.mxu0  ;;  %v2490_v41 = vld [vmem:[#allocation3] sm:$0xff]  }
 0x147   : > { %2133 = vst [vmem:[#allocation3 + $0x10] sm:$0xff] %v1985_v52   ;;  %v2528_v51 = vld [vmem:[#allocation4 + $0x20] ss:$8 sps:$4 sm:$0xff]   ;;  %v2500_v52 = vld [vmem:[#allocation4 + $0x74] ss:$8 sps:$4 sm:$0xff]  }
 0x148   : > { %v624_v54 = vpop.f32.mrf.mxu0 }
 0x14a   : > { %v2325_v55 = vpop.f32.mrf.mxu0 }
 0x14b   : > { %v2000_v56 = vpack.c.bf16 %v2325_v55, %v2324_v53  ;;  %v2530_v53 = vld [vmem:[#allocation4 + $0x34] ss:$8 sps:$4 sm:$0xff]   ;;  %v2534_v55 = vld [vmem:[#allocation4 + $0x30] ss:$8 sps:$4 sm:$0xff]  }
 0x14c   : > { %v627_v57 = vpop.f32.mrf.mxu0  ;;  %v2484_v35 = vld [vmem:[#allocation3 + $0x18] sm:$0xff]  }
 0x14d   : > { %2136 = vst [vmem:[#allocation3 + $0x28] sm:$0xff] %v2000_v56   ;;  %v1995_v58 = vpack.c.bf16 %v627_v57, %v624_v54  ;;  %v2502_v54 = vld [vmem:[#allocation4 + $0x70] ss:$8 sps:$4 sm:$0xff]   ;;  %v2503_v56 = vld [vmem:[#allocation4 + $0x84] ss:$8 sps:$4 sm:$0xff]  }
 0x14e   : > { %v2328_v59 = vpop.f32.mrf.mxu0  ;;  %v2486_v37 = vld [vmem:[#allocation3 + $0x10] sm:$0xff]   ;;  %v2505_v57 = vld [vmem:[#allocation4 + $0x80] ss:$8 sps:$4 sm:$0xff]  }
 0x14f   : > { %2135 = vst [vmem:[#allocation3 + $0x20] sm:$0xff] %v1995_v58   ;;  %v2506_v58 = vld [vmem:[#allocation4 + $0x94] ss:$8 sps:$4 sm:$0xff]  }
 0x150   : > { %v640_v61 = vpop.f32.mrf.mxu0 }
 0x152   : > { %v2329_v62 = vpop.f32.mrf.mxu0 }
 0x153   : > { %v2010_v63 = vpack.c.bf16 %v2329_v62, %v2328_v59  ;;  %v2508_v59 = vld [vmem:[#allocation4 + $0x90] ss:$8 sps:$4 sm:$0xff]   ;;  %v2515_v62 = vld [vmem:[#allocation4 + $0xb4] ss:$8 sps:$4 sm:$0xff]  }
 0x154   : > { %v643_v0 = vpop.f32.mrf.mxu0  ;;  %v2480_v31 = vld [vmem:[#allocation3 + $0x28] sm:$0xff]  }
 0x155   : > { %2138 = vst [vmem:[#allocation3 + $0x38] sm:$0xff] %v2010_v63   ;;  %v2005_v1 = vpack.c.bf16 %v643_v0, %v640_v61  ;;  %v2511_v61 = vld [vmem:[#allocation4 + $0xa0] ss:$8 sps:$4 sm:$0xff]   ;;  %v2517_v63 = vld [vmem:[#allocation4 + $0xb0] ss:$8 sps:$4 sm:$0xff]  }
 0x156   : > { %v2332_v2 = vpop.f32.mrf.mxu0  ;;  %v2482_v33 = vld [vmem:[#allocation3 + $0x20] sm:$0xff]  }
 0x157   : > { %2137 = vst [vmem:[#allocation3 + $0x30] sm:$0xff] %v2005_v1   ;;  %v2520_v0 = vld [vmem:[#allocation4 + $0xc4] ss:$8 sps:$4 sm:$0xff]   ;;  %v2523_v1 = vld [vmem:[#allocation4 + $0xc0] ss:$8 sps:$4 sm:$0xff]  }
 0x158   : > { %v656_v3 = vpop.f32.mrf.mxu0 }
 0x15a   : > { %v2333_v4 = vpop.f32.mrf.mxu0 }
 0x15b   : > { %v2020_v5 = vpack.c.bf16 %v2333_v4, %v2332_v2  ;;  %v2526_v2 = vld [vmem:[#allocation4 + $0xd4] ss:$8 sps:$4 sm:$0xff]   ;;  %v2532_v4 = vld [vmem:[#allocation4 + $0xe4] ss:$8 sps:$4 sm:$0xff]  }
 0x15c   : > { %v659_v6 = vpop.f32.mrf.mxu0  ;;  %v2476_v27 = vld [vmem:[#allocation3 + $0x38] sm:$0xff]  }
 0x15d   : > { %2140 = vst [vmem:[#allocation3 + $0x48] sm:$0xff] %v2020_v5   ;;  %v2015_v7 = vpack.c.bf16 %v659_v6, %v656_v3  ;;  %v2529_v3 = vld [vmem:[#allocation4 + $0xd0] ss:$8 sps:$4 sm:$0xff]   ;;  %v2535_v5 = vld [vmem:[#allocation4 + $0xe0] ss:$8 sps:$4 sm:$0xff]  }
 0x15e   : > { %v2336_v8 = vpop.f32.mrf.mxu0  ;;  %v2478_v29 = vld [vmem:[#allocation3 + $0x30] sm:$0xff]  }
 0x15f   : > { %2139 = vst [vmem:[#allocation3 + $0x40] sm:$0xff] %v2015_v7   ;;  %v2536_v6 = vld [vmem:[#allocation4 + $0xf4] ss:$8 sps:$4 sm:$0xff]   ;;  %v2538_v7 = vld [vmem:[#allocation4 + $0xf0] ss:$8 sps:$4 sm:$0xff]  }
 0x160   : > { %v672_v9 = vpop.f32.mrf.mxu0 }
 0x162   : > { %v2337_v10 = vpop.f32.mrf.mxu0 }
 0x163   : > { %v2030_v11 = vpack.c.bf16 %v2337_v10, %v2336_v8  ;;  %v2926_v10 = vld [vmem:[%s271_s9] ss:$0 sm:$0xff] }
 0x164   : > { %v675_v12 = vpop.f32.mrf.mxu0  ;;  %v2487_v38 = vld [vmem:[#allocation3 + $0x48] sm:$0xff]  }
 0x165   : > { %2142 = vst [vmem:[#allocation3 + $0x58] sm:$0xff] %v2030_v11   ;;  %v2025_v13 = vpack.c.bf16 %v675_v12, %v672_v9 }
 0x166   : > { %v2340_v14 = vpop.f32.mrf.mxu0  ;;  %v2489_v40 = vld [vmem:[#allocation3 + $0x40] sm:$0xff]  }
 0x167   : > { %2141 = vst [vmem:[#allocation3 + $0x50] sm:$0xff] %v2025_v13  }
 0x168   : > { %v688_v15 = vpop.f32.mrf.mxu0 }
 0x16a   : > { %v2341_v16 = vpop.f32.mrf.mxu0 }
 0x16b   : > { %v2040_v17 = vpack.c.bf16 %v2341_v16, %v2340_v14  ;;  %v1401_v14 = vstv %s1400_s11 }
 0x16c   : > { %v691_v18 = vpop.f32.mrf.mxu0  ;;  %v2483_v34 = vld [vmem:[#allocation3 + $0x58] sm:$0xff]   ;;  %vm2930_vm0 = vcmp.eq.s32.totalorder %v1401_v14, 1 }
 0x16d   : > { %2144 = vst [vmem:[#allocation3 + $0x68] sm:$0xff] %v2040_v17   ;;  %v2035_v19 = vpack.c.bf16 %v691_v18, %v688_v15 }
 0x16e   : > { %v2344_v20 = vpop.f32.mrf.mxu0  ;;  %v2485_v36 = vld [vmem:[#allocation3 + $0x50] sm:$0xff]  }
 0x16f   : > { %2143 = vst [vmem:[#allocation3 + $0x60] sm:$0xff] %v2035_v19  }
 0x170   : > { %v704_v21 = vpop.f32.mrf.mxu0 }
 0x172   : > { %v2345_v22 = vpop.f32.mrf.mxu0 }
 0x173   : > { %v2050_v23 = vpack.c.bf16 %v2345_v22, %v2344_v20 }
 0x174   : > { %v707_v24 = vpop.f32.mrf.mxu0  ;;  %v2479_v30 = vld [vmem:[#allocation3 + $0x68] sm:$0xff]  }
 0x175   : > { %2146 = vst [vmem:[#allocation3 + $0x78] sm:$0xff] %v2050_v23   ;;  %v2045_v25 = vpack.c.bf16 %v707_v24, %v704_v21 }
 0x176   : > { %v2481_v32 = vld [vmem:[#allocation3 + $0x60] sm:$0xff]  }
 0x177   : > { %2145 = vst [vmem:[#allocation3 + $0x70] sm:$0xff] %v2045_v25  }
 0x17c   : > { %v2475_v26 = vld [vmem:[#allocation3 + $0x78] sm:$0xff]  }
 0x17d   : > { %2186 = vmatprep.subr.bf16.mxu0 %v2475_v26  ;;  %2346 = vmatprep.subr.bf16.mxu1 %v2475_v26 }
 0x17e   : > { %v2477_v28 = vld [vmem:[#allocation3 + $0x70] sm:$0xff]   ;;  %2187 = vmatpush3.bf16.msra.mxu0 %v2476_v27  ;;  %2354 = vmatpush3.bf16.msra.mxu1 %v2476_v27 }
 0x17f   : > { %2188 = vmatprep.subr.bf16.mxu0 %v2477_v28  ;;  %2347 = vmatprep.subr.bf16.mxu1 %v2477_v28 }
 0x182   : > { %2189 = vmatpush3.bf16.msra.mxu0 %v2478_v29  ;;  %2355 = vmatpush3.bf16.msra.mxu1 %v2478_v29 }
 0x183   : > { %2190 = vmatprep.subr.bf16.mxu0 %v2479_v30  ;;  %2348 = vmatprep.subr.bf16.mxu1 %v2479_v30 }
 0x186   : > { %2191 = vmatpush3.bf16.msra.mxu0 %v2480_v31  ;;  %2356 = vmatpush3.bf16.msra.mxu1 %v2480_v31 }
 0x187   : > { %2192 = vmatprep.subr.bf16.mxu0 %v2481_v32  ;;  %2349 = vmatprep.subr.bf16.mxu1 %v2481_v32 }
 0x18a   : > { %2193 = vmatpush3.bf16.msra.mxu0 %v2482_v33  ;;  %2357 = vmatpush3.bf16.msra.mxu1 %v2482_v33 }
 0x18b   : > { %2194 = vmatprep.subr.bf16.mxu0 %v2483_v34  ;;  %2350 = vmatprep.subr.bf16.mxu1 %v2483_v34 }
 0x18e   : > { %2195 = vmatpush3.bf16.msra.mxu0 %v2484_v35  ;;  %2358 = vmatpush3.bf16.msra.mxu1 %v2484_v35 }
 0x18f   : > { %2196 = vmatprep.subr.bf16.mxu0 %v2485_v36  ;;  %2351 = vmatprep.subr.bf16.mxu1 %v2485_v36 }
 0x192   : > { %2197 = vmatpush3.bf16.msra.mxu0 %v2486_v37  ;;  %2359 = vmatpush3.bf16.msra.mxu1 %v2486_v37 }
 0x193   : > { %2198 = vmatprep.subr.bf16.mxu0 %v2487_v38  ;;  %2352 = vmatprep.subr.bf16.mxu1 %v2487_v38 }
 0x196   : > { %2199 = vmatpush3.bf16.msra.mxu0 %v2488_v39  ;;  %2360 = vmatpush3.bf16.msra.mxu1 %v2488_v39 }
 0x197   : > { %2200 = vmatprep.subr.bf16.mxu0 %v2489_v40  ;;  %2353 = vmatprep.subr.bf16.mxu1 %v2489_v40 }
 0x19a   : > { %2201 = vmatpush3.bf16.msra.mxu0 %v2490_v41  ;;  %2361 = vmatpush3.bf16.msra.mxu1 %v2490_v41 }
 0x19d   : > { %1271 = vmatmul.mubr.bf16.vlgmr.msra.gmra.mxu1 %v2491_v42  ;;  %1239 = vmatmul.mubr.bf16.vlgmr.msra.gmra.mxu0 %v2512_v43 }
 0x19e   : > { %1278 = vmatprep.mubr.bf16.mxu1 %v2494_v44  ;;  %1246 = vmatprep.mubr.bf16.mxu0 %v2518_v45 }
 0x1a5   : > { %1279 = vmatmul.mubr.bf16.gmra.mxu1 %v2496_v46  ;;  %1247 = vmatmul.mubr.bf16.gmra.mxu0 %v2522_v47 }
 0x1a6   : > { %1286 = vmatprep.mubr.bf16.mxu1 %v2497_v48  ;;  %1254 = vmatprep.mubr.bf16.mxu0 %v2524_v49 }
 0x1ad   : > { %1287 = vmatmul.mubr.bf16.gmra.mxu1 %v2499_v50  ;;  %1255 = vmatmul.mubr.bf16.gmra.mxu0 %v2528_v51 }
 0x1ae   : > { %1294 = vmatprep.mubr.bf16.mxu1 %v2500_v52  ;;  %1262 = vmatprep.mubr.bf16.mxu0 %v2530_v53 }
 0x1b5   : > { %1295 = vmatmul.mubr.bf16.gmra.mxu1 %v2502_v54  ;;  %1263 = vmatmul.mubr.bf16.gmra.mxu0 %v2534_v55 }
 0x1b6   : > { %1302 = vmatprep.mubr.bf16.mxu1 %v2503_v56 }
 0x1bd   : > { %1303 = vmatmul.mubr.bf16.gmra.mxu1 %v2505_v57 }
 0x1be   : > { %1310 = vmatprep.mubr.bf16.mxu1 %v2506_v58 }
 0x1c5   : > { %1311 = vmatmul.mubr.bf16.gmra.mxu1 %v2508_v59 }
 0x1c6   : > { %1318 = vmatprep.mubr.bf16.mxu1 %v2509_v60 }
 0x1cd   : > { %1319 = vmatmul.mubr.bf16.gmra.mxu1 %v2511_v61 }
 0x1ce   : > { %1326 = vmatprep.mubr.bf16.mxu1 %v2515_v62 }
 0x1d5   : > { %1327 = vmatmul.mubr.bf16.gmra.mxu1 %v2517_v63 }
 0x1d6   : > { %1334 = vmatprep.mubr.bf16.mxu1 %v2520_v0 }
 0x1dd   : > { %1335 = vmatmul.mubr.bf16.gmra.mxu1 %v2523_v1 }
 0x1de   : > { %1342 = vmatprep.mubr.bf16.mxu1 %v2526_v2 }
 0x1e5   : > { %1343 = vmatmul.mubr.bf16.gmra.mxu1 %v2529_v3 }
 0x1e6   : > { %1350 = vmatprep.mubr.bf16.mxu1 %v2532_v4 }
 0x1ed   : > { %1351 = vmatmul.mubr.bf16.gmra.mxu1 %v2535_v5 }
 0x1ee   : > { %1358 = vmatprep.mubr.bf16.mxu1 %v2536_v6 }
 0x1f5   : > { %1359 = vmatmul.mubr.bf16.gmra.mxu1 %v2538_v7 }
 0x25d   : > { %v2226_v8 = vpop.f32.mrf.mxu1  ;;  %v2202_v9 = vpop.f32.mrf.mxu0 }
 0x25f   : > { %v2227_v11 = vpop.f32.mrf.mxu1  ;;  %v2203_v12 = vpop.f32.mrf.mxu0 }
 0x260   : > { %v2228_v13 = vadd.f32 %v2227_v11, %v2226_v8  ;;  %v2204_v15 = vadd.f32 %v2203_v12, %v2202_v9 }
 0x261   : > { %v2229_v16 = vpop.f32.mrf.mxu1  ;;  %v2205_v17 = vpop.f32.mrf.mxu0 }
 0x262   : > { %v1273_v18 = vadd.f32 %v2228_v13, %v2926_v10  ;;  %v1241_v19 = vadd.f32 %v2204_v15, %v2926_v10 }
 0x263   : > { %v2230_v21 = vpop.f32.mrf.mxu1  ;;  %v2206_v22 = vpop.f32.mrf.mxu0 }
 0x264   : > { %v1376_v23 = vmax.f32 %v1273_v18, 0.0  ;;  %v2231_v24 = vadd.f32 %v2230_v21, %v2229_v16  ;;  %v1368_v25 = vmax.f32 %v1241_v19, 0.0  ;;  %v2207_v26 = vadd.f32 %v2206_v22, %v2205_v17 }
 0x265   : > { %v2232_v27 = vpop.f32.mrf.mxu1  ;;  %v2208_v28 = vpop.f32.mrf.mxu0 }
 0x266   : > { %v2936_v29 = vsel %vm2930_vm0, %v1273_v18, %v1376_v23  ;;  %v1276_v30 = vadd.f32 %v2231_v24, %v2926_v10  ;;  %v2941_v31 = vsel %vm2930_vm0, %v1241_v19, %v1368_v25  ;;  %v1244_v32 = vadd.f32 %v2207_v26, %v2926_v10 }
 0x267   : > { %v2233_v33 = vpop.f32.mrf.mxu1  ;;  %v2209_v34 = vpop.f32.mrf.mxu0 }
 0x268   : > { %v1377_v35 = vmax.f32 %v1276_v30, 0.0  ;;  %v2234_v36 = vadd.f32 %v2233_v33, %v2232_v27  ;;  %v1369_v37 = vmax.f32 %v1244_v32, 0.0  ;;  %v2210_v38 = vadd.f32 %v2209_v34, %v2208_v28 }
 0x269   : > { %v2235_v39 = vpop.f32.mrf.mxu1  ;;  %v2211_v40 = vpop.f32.mrf.mxu0 }
 0x26a   : > { %v2946_v41 = vsel %vm2930_vm0, %v1276_v30, %v1377_v35  ;;  %v1281_v42 = vadd.f32 %v2234_v36, %v2926_v10  ;;  %v2951_v43 = vsel %vm2930_vm0, %v1244_v32, %v1369_v37  ;;  %v1249_v44 = vadd.f32 %v2210_v38, %v2926_v10 }
 0x26b   : > { %v2236_v45 = vpop.f32.mrf.mxu1  ;;  %v2212_v46 = vpop.f32.mrf.mxu0 }
 0x26c   : > { %v1378_v47 = vmax.f32 %v1281_v42, 0.0  ;;  %v2237_v48 = vadd.f32 %v2236_v45, %v2235_v39  ;;  %v1370_v49 = vmax.f32 %v1249_v44, 0.0  ;;  %v2213_v50 = vadd.f32 %v2212_v46, %v2211_v40 }
 0x26d   : > { %v2238_v51 = vpop.f32.mrf.mxu1  ;;  %v2214_v52 = vpop.f32.mrf.mxu0 }
 0x26e   : > { %v2956_v53 = vsel %vm2930_vm0, %v1281_v42, %v1378_v47  ;;  %v1284_v54 = vadd.f32 %v2237_v48, %v2926_v10  ;;  %v2961_v55 = vsel %vm2930_vm0, %v1249_v44, %v1370_v49  ;;  %v1252_v56 = vadd.f32 %v2213_v50, %v2926_v10 }
 0x26f   : > { %v2239_v57 = vpop.f32.mrf.mxu1  ;;  %v2215_v58 = vpop.f32.mrf.mxu0 }
 0x270   : > { %v1379_v59 = vmax.f32 %v1284_v54, 0.0  ;;  %v2240_v60 = vadd.f32 %v2239_v57, %v2238_v51  ;;  %v1371_v61 = vmax.f32 %v1252_v56, 0.0  ;;  %v2216_v62 = vadd.f32 %v2215_v58, %v2214_v52 }
 0x271   : > { %v2241_v63 = vpop.f32.mrf.mxu1  ;;  %v2217_v0 = vpop.f32.mrf.mxu0 }
 0x272   : > { %v2966_v1 = vsel %vm2930_vm0, %v1284_v54, %v1379_v59  ;;  %v1289_v2 = vadd.f32 %v2240_v60, %v2926_v10  ;;  %v2971_v3 = vsel %vm2930_vm0, %v1252_v56, %v1371_v61  ;;  %v1257_v4 = vadd.f32 %v2216_v62, %v2926_v10 }
 0x273   : > { %v2242_v5 = vpop.f32.mrf.mxu1  ;;  %v2218_v6 = vpop.f32.mrf.mxu0 }
 0x274   : > { %v1380_v7 = vmax.f32 %v1289_v2, 0.0  ;;  %v2243_v8 = vadd.f32 %v2242_v5, %v2241_v63  ;;  %v1372_v9 = vmax.f32 %v1257_v4, 0.0  ;;  %v2219_v11 = vadd.f32 %v2218_v6, %v2217_v0 }
 0x275   : > { %v2244_v12 = vpop.f32.mrf.mxu1  ;;  %v2220_v13 = vpop.f32.mrf.mxu0 }
 0x276   : > { %v2976_v14 = vsel %vm2930_vm0, %v1289_v2, %v1380_v7  ;;  %v1292_v15 = vadd.f32 %v2243_v8, %v2926_v10  ;;  %v2981_v16 = vsel %vm2930_vm0, %v1257_v4, %v1372_v9  ;;  %v1260_v17 = vadd.f32 %v2219_v11, %v2926_v10 }
 0x277   : > { %v2245_v18 = vpop.f32.mrf.mxu1  ;;  %v2221_v19 = vpop.f32.mrf.mxu0 }
 0x278   : > { %v1381_v21 = vmax.f32 %v1292_v15, 0.0  ;;  %v2246_v22 = vadd.f32 %v2245_v18, %v2244_v12  ;;  %v1373_v23 = vmax.f32 %v1260_v17, 0.0  ;;  %v2222_v24 = vadd.f32 %v2221_v19, %v2220_v13 }
 0x279   : > { %v2247_v25 = vpop.f32.mrf.mxu1  ;;  %v2223_v26 = vpop.f32.mrf.mxu0 }
 0x27a   : > { %v2986_v27 = vsel %vm2930_vm0, %v1292_v15, %v1381_v21  ;;  %v1297_v28 = vadd.f32 %v2246_v22, %v2926_v10  ;;  %v2991_v30 = vsel %vm2930_vm0, %v1260_v17, %v1373_v23  ;;  %v1265_v32 = vadd.f32 %v2222_v24, %v2926_v10 }
 0x27b   : > { %v2248_v33 = vpop.f32.mrf.mxu1  ;;  %v2224_v34 = vpop.f32.mrf.mxu0 }
 0x27c   : > { %v1382_v35 = vmax.f32 %v1297_v28, 0.0  ;;  %v2249_v36 = vadd.f32 %v2248_v33, %v2247_v25  ;;  %v1374_v37 = vmax.f32 %v1265_v32, 0.0  ;;  %v2225_v38 = vadd.f32 %v2224_v34, %v2223_v26 }
 0x27d   : > { %v2250_v39 = vpop.f32.mrf.mxu1 }
 0x27e   : > { %v2996_v40 = vsel %vm2930_vm0, %v1297_v28, %v1382_v35  ;;  %v1300_v42 = vadd.f32 %v2249_v36, %v2926_v10  ;;  %v3001_v44 = vsel %vm2930_vm0, %v1265_v32, %v1374_v37  ;;  %v1268_v45 = vadd.f32 %v2225_v38, %v2926_v10 }
 0x27f   : > { %v2251_v46 = vpop.f32.mrf.mxu1 }
 0x280   : > { %v1383_v47 = vmax.f32 %v1300_v42, 0.0  ;;  %v2252_v48 = vadd.f32 %v2251_v46, %v2250_v39  ;;  %v1375_v49 = vmax.f32 %v1268_v45, 0.0 }
 0x281   : > { %v2253_v50 = vpop.f32.mrf.mxu1 }
 0x282   : > { %v3006_v51 = vsel %vm2930_vm0, %v1300_v42, %v1383_v47  ;;  %v1305_v52 = vadd.f32 %v2252_v48, %v2926_v10  ;;  %v3011_v54 = vsel %vm2930_vm0, %v1268_v45, %v1375_v49 }
 0x283   : > { %v2254_v56 = vpop.f32.mrf.mxu1 }
 0x284   : > { %v1384_v57 = vmax.f32 %v1305_v52, 0.0  ;;  %v2255_v58 = vadd.f32 %v2254_v56, %v2253_v50 }
 0x285   : > { %v2256_v59 = vpop.f32.mrf.mxu1 }
 0x286   : > { %v3015_v60 = vsel %vm2930_vm0, %v1305_v52, %v1384_v57  ;;  %v1308_v61 = vadd.f32 %v2255_v58, %v2926_v10 }
 0x287   : > { %v2257_v62 = vpop.f32.mrf.mxu1 }
 0x288   : > { %v1385_v63 = vmax.f32 %v1308_v61, 0.0  ;;  %v2258_v0 = vadd.f32 %v2257_v62, %v2256_v59 }
 0x289   : > { %v2259_v2 = vpop.f32.mrf.mxu1 }
 0x28a   : > { %v3020_v4 = vsel %vm2930_vm0, %v1308_v61, %v1385_v63  ;;  %v1313_v5 = vadd.f32 %v2258_v0, %v2926_v10 }
 0x28b   : > { %v2260_v6 = vpop.f32.mrf.mxu1 }
 0x28c   : > { %v1386_v7 = vmax.f32 %v1313_v5, 0.0  ;;  %v2261_v8 = vadd.f32 %v2260_v6, %v2259_v2 }
 0x28d   : > { %v2262_v9 = vpop.f32.mrf.mxu1 }
 0x28e   : > { %v3025_v11 = vsel %vm2930_vm0, %v1313_v5, %v1386_v7  ;;  %v1316_v12 = vadd.f32 %v2261_v8, %v2926_v10 }
 0x28f   : > { %v2263_v13 = vpop.f32.mrf.mxu1 }
 0x290   : > { %v1387_v15 = vmax.f32 %v1316_v12, 0.0  ;;  %v2264_v17 = vadd.f32 %v2263_v13, %v2262_v9 }
 0x291   : > { %v2265_v18 = vpop.f32.mrf.mxu1 }
 0x292   : > { %v3030_v19 = vsel %vm2930_vm0, %v1316_v12, %v1387_v15  ;;  %v1321_v21 = vadd.f32 %v2264_v17, %v2926_v10 }
 0x293   : > { %v2266_v22 = vpop.f32.mrf.mxu1 }
 0x294   : > { %v1388_v23 = vmax.f32 %v1321_v21, 0.0  ;;  %v2267_v24 = vadd.f32 %v2266_v22, %v2265_v18 }
 0x295   : > { %v2268_v25 = vpop.f32.mrf.mxu1 }
 0x296   : > { %v3035_v26 = vsel %vm2930_vm0, %v1321_v21, %v1388_v23  ;;  %v1324_v28 = vadd.f32 %v2267_v24, %v2926_v10 }
 0x297   : > { %v2269_v32 = vpop.f32.mrf.mxu1 }
 0x298   : > { %v1389_v33 = vmax.f32 %v1324_v28, 0.0  ;;  %v2270_v34 = vadd.f32 %v2269_v32, %v2268_v25 }
 0x299   : > { %v2271_v35 = vpop.f32.mrf.mxu1 }
 0x29a   : > { %v3040_v36 = vsel %vm2930_vm0, %v1324_v28, %v1389_v33  ;;  %v1329_v37 = vadd.f32 %v2270_v34, %v2926_v10 }
 0x29b   : > { %v2272_v38 = vpop.f32.mrf.mxu1 }
 0x29c   : > { %v1390_v39 = vmax.f32 %v1329_v37, 0.0  ;;  %v2273_v42 = vadd.f32 %v2272_v38, %v2271_v35 }
 0x29d   : > { %v2274_v45 = vpop.f32.mrf.mxu1 }
 0x29e   : > { %v3045_v46 = vsel %vm2930_vm0, %v1329_v37, %v1390_v39  ;;  %v1332_v47 = vadd.f32 %v2273_v42, %v2926_v10 }
 0x29f   : > { %v2275_v48 = vpop.f32.mrf.mxu1 }
 0x2a0   : > { %v1391_v49 = vmax.f32 %v1332_v47, 0.0  ;;  %v2276_v50 = vadd.f32 %v2275_v48, %v2274_v45 }
 0x2a1   : > { %v2277_v52 = vpop.f32.mrf.mxu1 }
 0x2a2   : > { %v3050_v56 = vsel %vm2930_vm0, %v1332_v47, %v1391_v49  ;;  %v1337_v57 = vadd.f32 %v2276_v50, %v2926_v10 }
 0x2a3   : > { %v2278_v58 = vpop.f32.mrf.mxu1 }
 0x2a4   : > { %v1392_v59 = vmax.f32 %v1337_v57, 0.0  ;;  %v2279_v61 = vadd.f32 %v2278_v58, %v2277_v52 }
 0x2a5   : > { %v2280_v62 = vpop.f32.mrf.mxu1 }
 0x2a6   : > { %v3055_v63 = vsel %vm2930_vm0, %v1337_v57, %v1392_v59  ;;  %v1340_v0 = vadd.f32 %v2279_v61, %v2926_v10 }
 0x2a7   : > { %v2281_v2 = vpop.f32.mrf.mxu1 }
 0x2a8   : > { %v1393_v5 = vmax.f32 %v1340_v0, 0.0  ;;  %v2282_v6 = vadd.f32 %v2281_v2, %v2280_v62 }
 0x2a9   : > { %v2283_v7 = vpop.f32.mrf.mxu1 }
 0x2aa   : > { %v3060_v8 = vsel %vm2930_vm0, %v1340_v0, %v1393_v5  ;;  %v1345_v9 = vadd.f32 %v2282_v6, %v2926_v10 }
 0x2ab   : > { %v2284_v12 = vpop.f32.mrf.mxu1 }
 0x2ac   : > { %v1394_v13 = vmax.f32 %v1345_v9, 0.0  ;;  %v2285_v15 = vadd.f32 %v2284_v12, %v2283_v7 }
 0x2ad   : > { %v2286_v17 = vpop.f32.mrf.mxu1 }
 0x2ae   : > { %v3065_v18 = vsel %vm2930_vm0, %v1345_v9, %v1394_v13  ;;  %v1348_v21 = vadd.f32 %v2285_v15, %v2926_v10 }
 0x2af   : > { %v2287_v22 = vpop.f32.mrf.mxu1 }
 0x2b0   : > { %v1395_v23 = vmax.f32 %v1348_v21, 0.0  ;;  %v2288_v24 = vadd.f32 %v2287_v22, %v2286_v17 }
 0x2b1   : > { %v2289_v25 = vpop.f32.mrf.mxu1 }
 0x2b2   : > { %v3070_v28 = vsel %vm2930_vm0, %v1348_v21, %v1395_v23  ;;  %v1353_v32 = vadd.f32 %v2288_v24, %v2926_v10 }
 0x2b3   : > { %v2290_v33 = vpop.f32.mrf.mxu1 }
 0x2b4   : > { %v1396_v34 = vmax.f32 %v1353_v32, 0.0  ;;  %v2291_v35 = vadd.f32 %v2290_v33, %v2289_v25 }
 0x2b5   : > { %v2292_v37 = vpop.f32.mrf.mxu1 }
 0x2b6   : > { %v3075_v38 = vsel %vm2930_vm0, %v1353_v32, %v1396_v34  ;;  %v1356_v39 = vadd.f32 %v2291_v35, %v2926_v10 }
 0x2b7   : > { %v2293_v42 = vpop.f32.mrf.mxu1 }
 0x2b8   : > { %v1397_v45 = vmax.f32 %v1356_v39, 0.0  ;;  %v2294_v47 = vadd.f32 %v2293_v42, %v2292_v37 }
 0x2b9   : > { %v2295_v48 = vpop.f32.mrf.mxu1 }
 0x2ba   : > { %v3080_v49 = vsel %vm2930_vm0, %v1356_v39, %v1397_v45  ;;  %v1361_v50 = vadd.f32 %v2294_v47, %v2926_v10 }
 0x2bb   : > { %v2296_v52 = vpop.f32.mrf.mxu1 }
 0x2bc   : > { %v1398_v57 = vmax.f32 %v1361_v50, 0.0  ;;  %v2297_v58 = vadd.f32 %v2296_v52, %v2295_v48 }
 0x2be   : > { %v3085_v59 = vsel %vm2930_vm0, %v1361_v50, %v1398_v57  ;;  %v1364_v61 = vadd.f32 %v2297_v58, %v2926_v10  ;;  %1440 = sbr.rel (%p1367_p5) target bundleno = 718 (0x2ce), region = 60 }
 0x2c0   : > { %v1399_v62 = vmax.f32 %v1364_v61, 0.0 }
 0x2c2   : > { %v3090_v0 = vsel %vm2930_vm0, %v1364_v61, %v1399_v62 }
 0x2c3   : > { %v2055_v2 = vpack.c.bf16 %v2951_v43, %v2941_v31  ;;  %v2060_v5 = vpack.c.bf16 %v2971_v3, %v2961_v55  ;;  %v2065_v6 = vpack.c.bf16 %v2991_v30, %v2981_v16  ;;  %v2070_v10 = vpack.c.bf16 %v3011_v54, %v3001_v44 }
 0x2c4   : > { %v2075_v20 = vpack.c.bf16 %v2946_v41, %v2936_v29  ;;  %v2080_v7 = vpack.c.bf16 %v2966_v1, %v2956_v53  ;;  %v2085_v9 = vpack.c.bf16 %v2986_v27, %v2976_v14  ;;  %v2090_v12 = vpack.c.bf16 %v3006_v51, %v2996_v40 }
 0x2c5   : > { %v2095_v13 = vpack.c.bf16 %v3020_v4, %v3015_v60  ;;  %v2100_v15 = vpack.c.bf16 %v3030_v19, %v3025_v11  ;;  %v2105_v17 = vpack.c.bf16 %v3040_v36, %v3035_v26  ;;  %v2110_v21 = vpack.c.bf16 %v3050_v56, %v3045_v46  ;;  %2056 = vst [vmem:[%s1572_s18] sm:$0xff] %v2055_v2  }
 0x2c6   : > { %2147 = vst [vmem:[%s1572_s18 + $0x8] sm:$0xff] %v2060_v5   ;;  %2148 = vst [vmem:[%s1572_s18 + $0x10] sm:$0xff] %v2065_v6   ;;  %v2115_v22 = vpack.c.bf16 %v3060_v8, %v3055_v63  ;;  %v2120_v23 = vpack.c.bf16 %v3070_v28, %v3065_v18  ;;  %v2125_v24 = vpack.c.bf16 %v3080_v49, %v3075_v38 }
 0x2c7   : > { %2149 = vst [vmem:[%s1572_s18 + $0x18] sm:$0xff] %v2070_v10   ;;  %2150 = vst [vmem:[%s1572_s18 + $0x20] sm:$0xff] %v2075_v20   ;;  %v2130_v25 = vpack.c.bf16 %v3090_v0, %v3085_v59 }
 0x2c8   : > { %2151 = vst [vmem:[%s1572_s18 + $0x28] sm:$0xff] %v2080_v7   ;;  %2152 = vst [vmem:[%s1572_s18 + $0x30] sm:$0xff] %v2085_v9  }
 0x2c9   : > { %2153 = vst [vmem:[%s1572_s18 + $0x38] sm:$0xff] %v2090_v12   ;;  %2154 = vst [vmem:[%s1572_s18 + $0x40] sm:$0xff] %v2095_v13  }
 0x2ca   : > { %2155 = vst [vmem:[%s1572_s18 + $0x48] sm:$0xff] %v2100_v15   ;;  %2156 = vst [vmem:[%s1572_s18 + $0x50] sm:$0xff] %v2105_v17  }
 0x2cb   : > { %2157 = vst [vmem:[%s1572_s18 + $0x58] sm:$0xff] %v2110_v21   ;;  %2158 = vst [vmem:[%s1572_s18 + $0x60] sm:$0xff] %v2115_v22  }
 0x2cc   : > { %2159 = vst [vmem:[%s1572_s18 + $0x68] sm:$0xff] %v2120_v23   ;;  %2160 = vst [vmem:[%s1572_s18 + $0x70] sm:$0xff] %v2125_v24  }
 0x2cd   : > { %2161 = vst [vmem:[%s1572_s18 + $0x78] sm:$0xff] %v2130_v25  }
 0x2ce PF: > { %1605 = vst [vmem:[#allocation10] sm:$0xff] %v2941_v31  ;;  %1606 = vst [vmem:[#allocation10 + $0x8] sm:$0xff] %v2951_v43  ;;  %p2392_p11 = scmp.eq.s32.totalorder %s2771_s21, 3  ;;  %s2714_s26 = smov [#allocation10]  }
 0x2cf   : > { %1607 = vst [vmem:[#allocation10 + $0x10] sm:$0xff] %v2961_v55  ;;  %1608 = vst [vmem:[#allocation10 + $0x18] sm:$0xff] %v2971_v3  ;;  %s1646_s6 = sshll.u32 %s2714_s26, 4  ;;  %s1647_s6 = int_to_ptr.vmem [resolvable:$true] %s1646_s6 }
 0x2d0   : > { %1609 = vst [vmem:[#allocation10 + $0x20] sm:$0xff] %v2981_v16  ;;  %1610 = vst [vmem:[#allocation10 + $0x28] sm:$0xff] %v2991_v30  ;;  %s2619_s7 = scalar_lea.vmem %s1647_s6, 4096  ;;  %p2626_p2 = scmp.lt.s32.totalorder %s1647_s6, %s1647_s6 }
 0x2d1   : > { %1611 = vst [vmem:[#allocation10 + $0x30] sm:$0xff] %v3001_v44  ;;  %1612 = vst [vmem:[#allocation10 + $0x38] sm:$0xff] %v3011_v54  ;;  %p2620_p0 = scmp.ne.s32.totalorder %s1647_s6, %s2619_s7  ;;  %p2627_p4 = scmp.lt.s32.totalorder %s2619_s7, %s2619_s7 }
 0x2d2   : > { %1613 = vst [vmem:[#allocation10 + $0x40] sm:$0xff] %v2936_v29  ;;  %1614 = vst [vmem:[#allocation10 + $0x48] sm:$0xff] %v2946_v41 }
 0x2d3   : > { %1615 = vst [vmem:[#allocation10 + $0x50] sm:$0xff] %v2956_v53  ;;  %1616 = vst [vmem:[#allocation10 + $0x58] sm:$0xff] %v2966_v1  ;;  %p2621_p1 = pnand %p2620_p0, %p2392_p11  ;;  %p2628_p13 = por %p2627_p4, %p2626_p2 }
 0x2d4   : > { %1617 = vst [vmem:[#allocation10 + $0x60] sm:$0xff] %v2976_v14  ;;  %1618 = vst [vmem:[#allocation10 + $0x68] sm:$0xff] %v2986_v27 }
 0x2d5   : > { %1619 = vst [vmem:[#allocation10 + $0x70] sm:$0xff] %v2996_v40  ;;  %1620 = vst [vmem:[#allocation10 + $0x78] sm:$0xff] %v3006_v51  ;;  %p2622_p3 = pneg %p2621_p1 }
 0x2d6   : > { %1621 = vst [vmem:[#allocation10 + $0x80] sm:$0xff] %v3015_v60  ;;  %1622 = vst [vmem:[#allocation10 + $0x88] sm:$0xff] %v3020_v4 }
 0x2d7   : > { %1623 = vst [vmem:[#allocation10 + $0x90] sm:$0xff] %v3025_v11  ;;  %1624 = vst [vmem:[#allocation10 + $0x98] sm:$0xff] %v3030_v19  ;;  %p2629_p10 = pnand %p2628_p13, %p2622_p3 }
 0x2d8   : > { %1625 = vst [vmem:[#allocation10 + $0xa0] sm:$0xff] %v3035_v26  ;;  %1626 = vst [vmem:[#allocation10 + $0xa8] sm:$0xff] %v3040_v36 }
 0x2d9   : > { %1627 = vst [vmem:[#allocation10 + $0xb0] sm:$0xff] %v3045_v46  ;;  %1628 = vst [vmem:[#allocation10 + $0xb8] sm:$0xff] %v3050_v56 }
 0x2da   : > { %1629 = vst [vmem:[#allocation10 + $0xc0] sm:$0xff] %v3055_v63  ;;  %1630 = vst [vmem:[#allocation10 + $0xc8] sm:$0xff] %v3060_v8 }
 0x2db   : > { %1631 = vst [vmem:[#allocation10 + $0xd0] sm:$0xff] %v3065_v18  ;;  %1632 = vst [vmem:[#allocation10 + $0xd8] sm:$0xff] %v3070_v28 }
 0x2dc   : > { %1633 = vst [vmem:[#allocation10 + $0xe0] sm:$0xff] %v3075_v38  ;;  %1634 = vst [vmem:[#allocation10 + $0xe8] sm:$0xff] %v3080_v49 }
 0x2dd   : > { %1635 = vst [vmem:[#allocation10 + $0xf0] sm:$0xff] %v3085_v59  ;;  %1636 = vst [vmem:[#allocation10 + $0xf8] sm:$0xff] %v3090_v0 }
 0x2de   : > { %2632 = shalt.err (!%p2629_p10)
}
 0x2df   : > { %s2715_s9 = smov 128   ;;  %s2716_s22 = smov 8  }
 0x2e0   : > { %2373 = dma.vmem_to_hbm [thread:$0]  (%p2392_p11), %s1647_s6, 4096, %s3193_s4, [#allocation6], %s2715_s9, %s2715_s9, %s2716_s22  }
 0x2e1   : > { %2680 = dma.done.wait (%p2392_p11), [#allocation6], 4096  }
 0x2e2   : > { %2682 = vsyncadd (%p2392_p11), [#allocation6], 4294963200 }
 0x2e3 PF: > { %s17_s20 = sadd.s32 1, %s2705_s20   ;;  %s3207_s15 = smov %s2689_s16 }
 0x2e4   : > { %p14_p9 = scmp.ge.s32.totalorder %s17_s20, 6   ;;  %s3208_s16 = smov %s2693_s17 }
 0x2e5   : > { %s3209_s17 = smov %s2852_s28  ;;  %s3210_s18 = smov %s2701_s19 }
 0x2e6   : > { %s3211_s19 = smov %s3213_s24  ;;  %16 = sbr.rel (!%p14_p9) target bundleno = 5 (0x5), region = 99 }
 0x2eb   :  { %1662 = vsyncpa [#allocation5], 1 }
 0x2ec   :  { %1664 = vsyncpa [#allocation5 + $0x1], 1 }
 0x2ed   :  { %1665 = vsyncpa [#allocation8], 1 }
 0x2ee   :  { %1666 = vsyncpa [#allocation6], 1 }
 0x2ef   :  { %1668 = vsyncpa [#allocation6 + $0x1], 1 }

</bundles_post_ra>
